<compile_context>
chip_gen: v7x
topology: tpu7x:2x2x1
jax: 0.10.0
libtpu: 0.0.40
codegen_flags: <defaults>
</compile_context>

<pallas_src>
import numpy as np
import jax
import jax.numpy as jnp
from jax.experimental import pallas as pl
from jax.experimental.pallas import tpu as pltpu

# ---------------- model dims (small, consistent with the module) ----------------
B = 2                                   # batch
C = 4                                   # image channels
H = W = 16                              # spatial
P = 8                                   # patch size
N_PATCH = (H // P) * (W // P)           # 4 patches
PATCH_DIM = C * P * P                   # 256
PROJECT_DIM = 512                       # clip ln_final width -> lp_layer is 512x512 (eye init)
NUM_CLASSES = 5                         # number of classnames / text prompts
PADDED_CLASSES = 128                    # lane-dense class dim (zero padded)


# ---------------- Pallas kernel: fused forward hot path ----------------
def custom_clip_kernel(pooled_ref, w_pe_ref, w_tail_ref, out_ref):
    # visual patch-embed on pre-pooled patches: [B, 256] @ [256, 512] -> [B, 512]
    # bf16 x bf16 MXU pass, f32 accumulation.
    feat = jnp.dot(pooled_ref[...], w_pe_ref[...],
                   preferred_element_type=jnp.float32)
    # fused frozen tail: exp(logit_scale) * (proj @ lp.T @ text.T), class dim padded
    # to 128 lanes: [B, 512] @ [512, 128] -> [B, 128]
    logits = jnp.dot(feat.astype(w_tail_ref.dtype), w_tail_ref[...],
                     preferred_element_type=jnp.float32)
    out_ref[...] = logits.astype(out_ref.dtype)


# ---------------- host-side glue ----------------
def patchify_and_pool(image):
    """NCHW image -> mean-pooled patch vectors [B, C*P*P].

    Mean-pooling commutes with the linear patch embedding, so pooling here is
    numerically identical to embedding every patch and averaging the tokens.
    """
    b, c, h, w = image.shape
    x = image.reshape(b, c, h // P, P, w // P, P)
    x = x.transpose(0, 2, 4, 1, 3, 5)                       # [B, h/P, w/P, C, P, P]
    patches = x.reshape(b, N_PATCH, PATCH_DIM).astype(jnp.float32)
    return patches.mean(axis=1)                             # [B, PATCH_DIM]


def prepare_inference_params(params):
    """Compose the frozen tail chain once on the host (all buffers are static)."""
    scale = jnp.exp(params["logit_scale"][0])
    # W_tail = exp(logit_scale) * w_visual_proj @ lp_layer.weight.T @ text_features.T
    w_tail = params["w_visual_proj"] @ params["w_lp"].T @ params["text_features"].T
    w_tail = scale * w_tail                                  # [512, NUM_CLASSES]
    w_tail = jnp.pad(w_tail, ((0, 0), (0, PADDED_CLASSES - NUM_CLASSES)))
    # lp_layer.bias folds into a per-class additive logit bias (zeros at module init).
    logit_bias = scale * (params["b_lp"] @ params["text_features"].T)  # [1, NUM_CLASSES]
    return {
        "w_pe": params["w_patch_embed"].astype(jnp.bfloat16),   # [256, 512] bf16
        "w_tail": w_tail.astype(jnp.bfloat16),                  # [512, 128] bf16
        "logit_bias": logit_bias,                                # [1, 5] f32 (zeros here)
    }


def custom_clip_forward(image, prep):
    """image: [B, C, H, W] float32 (NCHW, as in PyTorch)."""
    pooled = patchify_and_pool(image).astype(jnp.bfloat16)      # [B, 256] bf16

    vmem = pl.BlockSpec(memory_space=pltpu.MemorySpace.VMEM)
    out_padded = pl.pallas_call(
        custom_clip_kernel,
        out_shape=jax.ShapeDtypeStruct((image.shape[0], PADDED_CLASSES), jnp.float32),
        in_specs=[vmem, vmem, vmem],
        out_specs=vmem,
    )(pooled, prep["w_pe"], prep["w_tail"])

    return out_padded[:, :NUM_CLASSES] + prep["logit_bias"]     # [B, NUM_CLASSES]


# ---------------- parameters (synthetic stand-in for CLIP buffers) ----------------
def make_params(key):
    k1, k2, k3 = jax.random.split(key, 3)
    # synthetic visual-encoder weights (stand-in for clip_model.visual)
    w_pe = jax.random.normal(k1, (PATCH_DIM, PROJECT_DIM), jnp.float32) * 0.02
    w_proj = jax.random.normal(k2, (PROJECT_DIM, PROJECT_DIM), jnp.float32) * 0.02
    # lp_layer: weight = eye(512), bias = zeros(512)  (exactly as in __init__)
    w_lp = jnp.eye(PROJECT_DIM, dtype=jnp.float32)
    b_lp = jnp.zeros((1, PROJECT_DIM), jnp.float32)
    # text_features buffer: normalized rows (as produced by preprocess())
    tf = jax.random.normal(k3, (NUM_CLASSES, PROJECT_DIM), jnp.float32)
    tf = tf / jnp.linalg.norm(tf, axis=-1, keepdims=True)
    # CLIP logit_scale init: ln(1/0.07)
    logit_scale = jnp.array([np.log(1.0 / 0.07)], jnp.float32)
    return {
        "w_patch_embed": w_pe,
        "w_visual_proj": w_proj,
        "w_lp": w_lp,
        "b_lp": b_lp,
        "text_features": tf,
        "logit_scale": logit_scale,
    }


# ---------------- references ----------------
def reference_fused(image, prep):
    """Mirrors the kernel's math exactly (same bf16-rounded operands)."""
    pooled = patchify_and_pool(image).astype(jnp.bfloat16).astype(jnp.float32)
    w_pe = prep["w_pe"].astype(jnp.float32)
    w_tail = prep["w_tail"].astype(jnp.float32)
    feat = pooled @ w_pe
    feat = feat.astype(jnp.bfloat16).astype(jnp.float32)
    return (feat @ w_tail)[:, :NUM_CLASSES] + prep["logit_bias"]


def reference_module(image, params):
    """Un-fused f32 chain mirroring the PyTorch module forward."""
    b = image.shape[0]
    x = image.reshape(b, C, H // P, P, W // P, P).transpose(0, 2, 4, 1, 3, 5)
    patches = x.reshape(b, N_PATCH, PATCH_DIM).astype(jnp.float32)
    tokens = patches @ params["w_patch_embed"]               # per-patch embed
    pooled = tokens.mean(axis=1)                             # mean pool
    img_feat = pooled @ params["w_visual_proj"]              # visual projection
    img_feat = img_feat @ params["w_lp"].T + params["b_lp"]  # lp_layer (eye, zero bias)
    return jnp.exp(params["logit_scale"][0]) * (img_feat @ params["text_features"].T)


if __name__ == "__main__":
    key = jax.random.PRNGKey(0)
    kp, kx = jax.random.split(key)
    params = make_params(kp)
    prep = prepare_inference_params(params)
    image = jax.random.normal(kx, (B, C, H, W), jnp.float32)   # NCHW, like PyTorch

    logits = custom_clip_forward(image, prep)
    logits = jax.block_until_ready(logits)
    assert logits.shape == (B, NUM_CLASSES)

    # strict check: kernel vs identical bf16-operand math
    ref_fused = reference_fused(image, prep)
    np.testing.assert_allclose(np.asarray(logits), np.asarray(ref_fused),
                               rtol=1e-3, atol=1e-3)

    # semantic check: kernel vs un-fused f32 module chain (bf16 weight rounding budget)
    ref_mod = reference_module(image, params)
    np.testing.assert_allclose(np.asarray(logits), np.asarray(ref_mod),
                               rtol=2e-2, atol=2e-2)

    print("KERNEL_OK")
</pallas_src>

<mosaic_0001>
module attributes {stable_mosaic.version = 11 : i64} {
  func.func @custom_clip_kernel(%arg0: memref<2x256xbf16, #tpu.memory_space<vmem>>, %arg1: memref<256x512xbf16, #tpu.memory_space<vmem>>, %arg2: memref<512x128xbf16, #tpu.memory_space<vmem>>, %arg3: memref<2x128xf32, #tpu.memory_space<vmem>>) attributes {dimension_semantics = [], scalar_prefetch = 0 : i64, scratch_operands = 0 : i64, tpu.core_type = #tpu.core_type<tc>} {
    %c0 = arith.constant 0 : index
    %c0_0 = arith.constant 0 : index
    %0 = vector.load %arg0[%c0, %c0_0] : memref<2x256xbf16, #tpu.memory_space<vmem>>, vector<2x256xbf16>
    %c0_1 = arith.constant 0 : index
    %c0_2 = arith.constant 0 : index
    %1 = vector.load %arg1[%c0_1, %c0_2] : memref<256x512xbf16, #tpu.memory_space<vmem>>, vector<256x512xbf16>
    %cst = arith.constant dense<0.000000e+00> : vector<2x512xf32>
    %2 = tpu.matmul %0, %1, %cst {dimension_numbers = #tpu.dot_dimension_numbers<[1], [0], [0], [1], [0, 0, 1, 1], [], []>} : vector<2x256xbf16>, vector<256x512xbf16>, vector<2x512xf32> -> vector<2x512xf32>
    %3 = arith.truncf %2 : vector<2x512xf32> to vector<2x512xbf16>
    %c0_3 = arith.constant 0 : index
    %c0_4 = arith.constant 0 : index
    %4 = vector.load %arg2[%c0_3, %c0_4] : memref<512x128xbf16, #tpu.memory_space<vmem>>, vector<512x128xbf16>
    %cst_5 = arith.constant dense<0.000000e+00> : vector<2x128xf32>
    %5 = tpu.matmul %3, %4, %cst_5 {dimension_numbers = #tpu.dot_dimension_numbers<[1], [0], [0], [1], [0, 0, 1, 1], [], []>} : vector<2x512xbf16>, vector<512x128xbf16>, vector<2x128xf32> -> vector<2x128xf32>
    %c0_6 = arith.constant 0 : index
    %c0_7 = arith.constant 0 : index
    %6 = vector.load %arg3[%c0_6, %c0_7] : memref<2x128xf32, #tpu.memory_space<vmem>>, vector<2x128xf32>
    tpu.vector_store %arg3[%c0_6, %c0_7], %5 {strides = array<i32>} : memref<2x128xf32, #tpu.memory_space<vmem>>, vector<2x128xf32>,
    return
  }
}

</mosaic_0001>

<bundles_post_ra>
// kernel: tpu_custom_call.1
= control target key start
LH: loop header
LB: loop body
LE: loop exit
PB: predicated region body
PF: predicated region fallthrough
CT: control target
= control target key end

     0   :  { %8 = vsyncpa [#allocation3], 0  ;;  %s1353_s0 = inlined_call_operand.hbm [shape: bf16[2,256], index: 0, kind: input, shape index: {}]   ;;  %s1354_s1 = inlined_call_operand.hbm [shape: bf16[256,512], index: 1, kind: input, shape index: {}]   ;;  %s1355_s2 = inlined_call_operand.hbm [shape: bf16[512,128], index: 2, kind: input, shape index: {}]   ;;  %s1356_s3 = inlined_call_operand.hbm [shape: f32[2,128], index: 3, kind: output, shape index: {}]  }
   0x1   :  { %9 = vsyncpa [#allocation6], 0 }
   0x2   :  { %10 = vsyncpa [#allocation4], 0  ;;  %s1276_s12 = smov [#allocation5]   ;;  %s1182_s16 = scalar_lea.hbm %s1354_s1, 8192 }
   0x3   :  { %s26_s13 = sshll.u32 %s1276_s12, 4  ;;  %p1183_p0 = scmp.ne.s32.totalorder %s1354_s1, %s1182_s16  ;;  %s27_s13 = int_to_ptr.vmem [resolvable:$true] %s26_s13 }
   0x4   :  { %p1186_p1 = scmp.lt.u32.totalorder %s1182_s16, %s1354_s1 }
   0x6   :  { %p1188_p2 = pnand %p1186_p1, %p1183_p0 }
   0x8   :  { %1191 = shalt.err (!%p1188_p2)
}
   0x9   :  { %s1192_s21 = scalar_lea.vmem %s27_s13, 8192  ;;  %p1197_p4 = scmp.lt.s32.totalorder %s27_s13, %s27_s13 }
   0xa   :  { %p1193_p3 = scmp.ne.s32.totalorder %s27_s13, %s1192_s21  ;;  %p1198_p5 = scmp.lt.s32.totalorder %s1192_s21, %s1192_s21 }
   0xc   :  { %p1199_p6 = por %p1198_p5, %p1197_p4 }
   0xe   :  { %p1200_p7 = pnand %p1199_p6, %p1193_p3 }
  0x10   :  { %1203 = shalt.err (!%p1200_p7)
}
  0x11   :  { %s1277_s22 = smov 256   ;;  %s1278_s23 = smov 16  }
  0x12   :  { %32 = dma.hbm_to_vmem [thread:$0]  %s1354_s1, 8192, %s27_s13, [#allocation6], %s1277_s22, %s1277_s22, %s1278_s23  }
  0x13   :  { %s1279_s26 = smov [#allocation2]   ;;  %s1280_s28 = smov [#allocation7]  }
  0x14   :  { %s17_s27 = sshll.u32 %s1279_s26, 4  ;;  %s38_s29 = sshll.u32 %s1280_s28, 4  ;;  %s18_s27 = int_to_ptr.vmem [resolvable:$true] %s17_s27  ;;  %s39_s29 = int_to_ptr.vmem [resolvable:$true] %s38_s29 }
  0x15   :  { %s1204_s5 = scalar_lea.hbm %s1353_s0, 32 }
  0x16   :  { %p1205_p8 = scmp.ne.s32.totalorder %s1353_s0, %s1204_s5  ;;  %p1208_p9 = scmp.lt.u32.totalorder %s1204_s5, %s1353_s0 }
  0x18   :  { %p1210_p10 = pnand %p1208_p9, %p1205_p8 }
  0x1a   :  { %1213 = shalt.err (!%p1210_p10)
}
  0x1b   :  { %s1214_s1 = scalar_lea.vmem %s18_s27, 32  ;;  %p1219_p12 = scmp.lt.s32.totalorder %s18_s27, %s18_s27 }
  0x1c   :  { %p1215_p11 = scmp.ne.s32.totalorder %s18_s27, %s1214_s1  ;;  %p1220_p13 = scmp.lt.s32.totalorder %s1214_s1, %s1214_s1 }
  0x1e   :  { %p1221_p0 = por %p1220_p13, %p1219_p12 }
  0x20   :  { %p1222_p1 = pnand %p1221_p0, %p1215_p11 }
  0x22   :  { %1225 = shalt.err (!%p1222_p1)
}
  0x23   :  { %20 = dma.hbm_to_vmem [thread:$0]  %s1353_s0, 32, %s18_s27, [#allocation3]  }
  0x24   :  { %s1226_s14 = scalar_lea.hbm %s1355_s2, 4096 }
  0x25   :  { %p1227_p2 = scmp.ne.s32.totalorder %s1355_s2, %s1226_s14  ;;  %p1230_p3 = scmp.lt.u32.totalorder %s1226_s14, %s1355_s2 }
  0x27   :  { %p1232_p4 = pnand %p1230_p3, %p1227_p2 }
  0x29   :  { %1235 = shalt.err (!%p1232_p4)
}
  0x2a   :  { %s1236_s19 = scalar_lea.vmem %s39_s29, 4096  ;;  %p1241_p6 = scmp.lt.s32.totalorder %s39_s29, %s39_s29 }
  0x2b   :  { %p1237_p5 = scmp.ne.s32.totalorder %s39_s29, %s1236_s19  ;;  %p1242_p7 = scmp.lt.s32.totalorder %s1236_s19, %s1236_s19 }
  0x2d   :  { %p1243_p8 = por %p1242_p7, %p1241_p6 }
  0x2f   :  { %p1244_p9 = pnand %p1243_p8, %p1237_p5 }
  0x31   :  { %1247 = shalt.err (!%p1244_p9)
}
  0x32   :  { %s1281_s0 = smov 64   ;;  %s1282_s20 = smov 4  }
  0x33   :  { %44 = dma.hbm_to_vmem [thread:$0]  %s1355_s2, 4096, %s39_s29, [#allocation6], %s1281_s0, %s1281_s0, %s1282_s20  }
  0x34   :  { %1270 = dma.done.wait [#allocation3], 32  }
  0x35   :  { %1271 = vsyncadd [#allocation3], 4294967264 }
  0x36   :  { %1272 = dma.done.wait [#allocation6], 12288  }
  0x37   :  { %1273 = vsyncadd [#allocation6], 4294955008  ;;  %v1054_v0 = vld [vmem:[#allocation5 + $0x4] ss:$16 sps:$4 sm:$0xff]   ;;  %v1056_v1 = vld [vmem:[#allocation5 + $0xc] ss:$16 sps:$4 sm:$0xff]   ;;  %v132_v40 = vlaneseq }
  0x38   :  { %465 = vmatprep.subr.bf16.mxu0 %v1054_v0  ;;  %v1058_v2 = vld [vmem:[#allocation5] ss:$16 sps:$4 sm:$0xff]   ;;  %v1059_v3 = vld [vmem:[#allocation5 + $0x8] ss:$16 sps:$4 sm:$0xff]   ;;  %506 = vmatprep.subr.bf16.mxu1 %v1056_v1  ;;  %v1060_v4 = vld [vmem:[#allocation5 + $0x24] ss:$16 sps:$4 sm:$0xff]  }
  0x39   :  { %466 = vmatpush1.bf16.msra.mxu0 %v1058_v2  ;;  %507 = vmatpush1.bf16.msra.mxu1 %v1059_v3  ;;  %v1062_v5 = vld [vmem:[#allocation5 + $0x2c] ss:$16 sps:$4 sm:$0xff]   ;;  %v1064_v6 = vld [vmem:[#allocation5 + $0x20] ss:$16 sps:$4 sm:$0xff]   ;;  %v1065_v7 = vld [vmem:[#allocation5 + $0x28] ss:$16 sps:$4 sm:$0xff]  }
  0x3a   :  { %467 = vmatprep.subr.bf16.mxu0 %v1060_v4  ;;  %508 = vmatprep.subr.bf16.mxu1 %v1062_v5  ;;  %v1066_v8 = vld [vmem:[#allocation5 + $0x44] ss:$16 sps:$4 sm:$0xff]   ;;  %v1068_v9 = vld [vmem:[#allocation5 + $0x4c] ss:$16 sps:$4 sm:$0xff]   ;;  %v1070_v10 = vld [vmem:[#allocation5 + $0x40] ss:$16 sps:$4 sm:$0xff]  }
  0x3b   :  { %v1071_v11 = vld [vmem:[#allocation5 + $0x48] ss:$16 sps:$4 sm:$0xff]   ;;  %v1072_v12 = vld [vmem:[#allocation5 + $0x64] ss:$16 sps:$4 sm:$0xff]   ;;  %v1074_v13 = vld [vmem:[#allocation5 + $0x6c] ss:$16 sps:$4 sm:$0xff]  }
  0x3c   :  { %v1076_v14 = vld [vmem:[#allocation5 + $0x60] ss:$16 sps:$4 sm:$0xff]   ;;  %v1077_v15 = vld [vmem:[#allocation5 + $0x68] ss:$16 sps:$4 sm:$0xff]   ;;  %v1078_v16 = vld [vmem:[#allocation5 + $0x84] ss:$16 sps:$4 sm:$0xff]  }
  0x3d   :  { %468 = vmatpush1.bf16.msra.mxu0 %v1064_v6  ;;  %509 = vmatpush1.bf16.msra.mxu1 %v1065_v7  ;;  %v1080_v17 = vld [vmem:[#allocation5 + $0x8c] ss:$16 sps:$4 sm:$0xff]   ;;  %v1082_v18 = vld [vmem:[#allocation5 + $0x80] ss:$16 sps:$4 sm:$0xff]   ;;  %v1083_v19 = vld [vmem:[#allocation5 + $0x88] ss:$16 sps:$4 sm:$0xff]  }
  0x3e   :  { %469 = vmatprep.subr.bf16.mxu0 %v1066_v8  ;;  %510 = vmatprep.subr.bf16.mxu1 %v1068_v9  ;;  %v1084_v20 = vld [vmem:[#allocation5 + $0xa4] ss:$16 sps:$4 sm:$0xff]   ;;  %v1086_v21 = vld [vmem:[#allocation5 + $0xac] ss:$16 sps:$4 sm:$0xff]   ;;  %v1088_v22 = vld [vmem:[#allocation5 + $0xa0] ss:$16 sps:$4 sm:$0xff]  }
  0x3f   :  { %v1089_v23 = vld [vmem:[#allocation5 + $0xa8] ss:$16 sps:$4 sm:$0xff]   ;;  %v1090_v24 = vld [vmem:[#allocation5 + $0xc4] ss:$16 sps:$4 sm:$0xff]   ;;  %v1092_v25 = vld [vmem:[#allocation5 + $0xcc] ss:$16 sps:$4 sm:$0xff]  }
  0x40   :  { %v1094_v26 = vld [vmem:[#allocation5 + $0xc0] ss:$16 sps:$4 sm:$0xff]   ;;  %v1095_v27 = vld [vmem:[#allocation5 + $0xc8] ss:$16 sps:$4 sm:$0xff]   ;;  %v1096_v28 = vld [vmem:[#allocation5 + $0xe4] ss:$16 sps:$4 sm:$0xff]  }
  0x41   :  { %470 = vmatpush1.bf16.msra.mxu0 %v1070_v10  ;;  %511 = vmatpush1.bf16.msra.mxu1 %v1071_v11  ;;  %v1098_v29 = vld [vmem:[#allocation5 + $0xec] ss:$16 sps:$4 sm:$0xff]   ;;  %v1100_v30 = vld [vmem:[#allocation5 + $0xe0] ss:$16 sps:$4 sm:$0xff]   ;;  %v1101_v31 = vld [vmem:[#allocation5 + $0xe8] ss:$16 sps:$4 sm:$0xff]  }
  0x42   :  { %471 = vmatprep.subr.bf16.mxu0 %v1072_v12  ;;  %512 = vmatprep.subr.bf16.mxu1 %v1074_v13  ;;  %v1102_v32 = vld [vmem:[#allocation5 + $0x104] ss:$16 sps:$4 sm:$0xff]   ;;  %v1104_v33 = vld [vmem:[#allocation5 + $0x10c] ss:$16 sps:$4 sm:$0xff]   ;;  %v1106_v34 = vld [vmem:[#allocation5 + $0x100] ss:$16 sps:$4 sm:$0xff]  }
  0x43   :  { %v1107_v35 = vld [vmem:[#allocation5 + $0x108] ss:$16 sps:$4 sm:$0xff]   ;;  %v1108_v36 = vld [vmem:[#allocation5 + $0x124] ss:$16 sps:$4 sm:$0xff]   ;;  %v1110_v37 = vld [vmem:[#allocation5 + $0x12c] ss:$16 sps:$4 sm:$0xff]  }
  0x44   :  { %v1283_v38 = vmov 1966171168   ;;  %v1112_v41 = vld [vmem:[#allocation5 + $0x120] ss:$16 sps:$4 sm:$0xff]   ;;  %v1113_v42 = vld [vmem:[#allocation5 + $0x128] ss:$16 sps:$4 sm:$0xff]  }
  0x45   :  { %472 = vmatpush1.bf16.msra.mxu0 %v1076_v14  ;;  %513 = vmatpush1.bf16.msra.mxu1 %v1077_v15  ;;  %v130_v39 = vunpack.c.l.s4 %v1283_v38  ;;  %v1114_v43 = vld [vmem:[#allocation5 + $0x144] ss:$16 sps:$4 sm:$0xff]   ;;  %v1116_v44 = vld [vmem:[#allocation5 + $0x14c] ss:$16 sps:$4 sm:$0xff]   ;;  %v133_v46 = vshrl.u32 %v132_v40, 7  ;;  %s1284_s2 = smov [#allocation8]  }
  0x46   :  { %473 = vmatprep.subr.bf16.mxu0 %v1078_v16  ;;  %514 = vmatprep.subr.bf16.mxu1 %v1080_v17  ;;  %v1118_v47 = vld [vmem:[#allocation5 + $0x140] ss:$16 sps:$4 sm:$0xff]   ;;  %v1119_v48 = vld [vmem:[#allocation5 + $0x148] ss:$16 sps:$4 sm:$0xff]   ;;  %v1120_v49 = vld [vmem:[#allocation5 + $0x164] ss:$16 sps:$4 sm:$0xff]  }
  0x47   :  { %v131_v45 = vunpack.c.0.s8 %v130_v39  ;;  %v1122_v50 = vld [vmem:[#allocation5 + $0x16c] ss:$16 sps:$4 sm:$0xff]   ;;  %v1124_v51 = vld [vmem:[#allocation5 + $0x160] ss:$16 sps:$4 sm:$0xff]   ;;  %v1125_v52 = vld [vmem:[#allocation5 + $0x168] ss:$16 sps:$4 sm:$0xff]  }
  0x48   :  { %v904_v54 = vld.sshfl [vmem:[#allocation2] sm:$0x11 pattern:$0x75316420]  ;;  %v1126_v55 = vld [vmem:[#allocation5 + $0x184] ss:$16 sps:$4 sm:$0xff]  }
  0x49   :  { %474 = vmatpush1.bf16.msra.mxu0 %v1082_v18  ;;  %515 = vmatpush1.bf16.msra.mxu1 %v1083_v19  ;;  %v134_v53 = vsub.s32 %v131_v45, %v133_v46  ;;  %v128_v56 = vcombine.high %v904_v54, %v904_v54  ;;  %v1128_v57 = vld [vmem:[#allocation5 + $0x18c] ss:$16 sps:$4 sm:$0xff]   ;;  %v1130_v58 = vld [vmem:[#allocation5 + $0x180] ss:$16 sps:$4 sm:$0xff]   ;;  %v1131_v60 = vld [vmem:[#allocation5 + $0x188] ss:$16 sps:$4 sm:$0xff]  }
  0x4a   :  { %475 = vmatprep.subr.bf16.mxu0 %v1084_v20  ;;  %516 = vmatprep.subr.bf16.mxu1 %v1086_v21  ;;  %v1132_v61 = vld [vmem:[#allocation5 + $0x1a4] ss:$16 sps:$4 sm:$0xff]   ;;  %v1134_v62 = vld [vmem:[#allocation5 + $0x1ac] ss:$16 sps:$4 sm:$0xff]   ;;  %v1136_v63 = vld [vmem:[#allocation5 + $0x1a0] ss:$16 sps:$4 sm:$0xff]  }
  0x4b   :  { %v142_v59 = vrot.slane %v128_v56, %v134_v53  ;;  %v1137_v0 = vld [vmem:[#allocation5 + $0x1a8] ss:$16 sps:$4 sm:$0xff]   ;;  %v1138_v1 = vld [vmem:[#allocation5 + $0x1c4] ss:$16 sps:$4 sm:$0xff]   ;;  %v1140_v2 = vld [vmem:[#allocation5 + $0x1cc] ss:$16 sps:$4 sm:$0xff]   ;;  %v135_v12 = vrot.slane %v904_v54, %v134_v53 }
  0x4c   :  { %v1142_v3 = vld [vmem:[#allocation5 + $0x1c0] ss:$16 sps:$4 sm:$0xff]   ;;  %v1143_v4 = vld [vmem:[#allocation5 + $0x1c8] ss:$16 sps:$4 sm:$0xff]   ;;  %v1144_v5 = vld [vmem:[#allocation5 + $0x1e4] ss:$16 sps:$4 sm:$0xff]  }
  0x4d   :  { %476 = vmatpush1.bf16.msra.mxu0 %v1088_v22  ;;  %517 = vmatpush1.bf16.msra.mxu1 %v1089_v23  ;;  %v1146_v6 = vld [vmem:[#allocation5 + $0x1ec] ss:$16 sps:$4 sm:$0xff]   ;;  %v1148_v7 = vld [vmem:[#allocation5 + $0x1e0] ss:$16 sps:$4 sm:$0xff]   ;;  %v1149_v8 = vld [vmem:[#allocation5 + $0x1e8] ss:$16 sps:$4 sm:$0xff]  }
  0x4e   :  { %477 = vmatprep.subr.bf16.mxu0 %v1090_v24  ;;  %518 = vmatprep.subr.bf16.mxu1 %v1092_v25  ;;  %v1150_v9 = vld [vmem:[#allocation7 + $0x40] sm:$0xff]   ;;  %v1154_v14 = vld [vmem:[#allocation7 + $0x48] sm:$0xff]   ;;  %v1158_v18 = vld [vmem:[#allocation7 + $0x50] sm:$0xff]   ;;  %s894_s23 = sshll.u32 %s1284_s2, 4  ;;  %s895_s23 = int_to_ptr.vmem [resolvable:$true] %s894_s23 }
  0x4f   :  { %497 = vmatprep.mubr.bf16.mxu0 %v142_v59  ;;  %538 = vmatprep.mubr.bf16.mxu1 %v142_v59  ;;  %v1151_v10 = vld [vmem:[#allocation7 + $0xc0] sm:$0xff]   ;;  %v1155_v15 = vld [vmem:[#allocation7 + $0xc8] sm:$0xff]   ;;  %v1159_v19 = vld [vmem:[#allocation7 + $0xd0] sm:$0xff]   ;;  %s1248_s24 = scalar_lea.vmem %s895_s23, 32  ;;  %p1253_p11 = scmp.lt.s32.totalorder %s895_s23, %s895_s23 }
  0x50   :  { %v1152_v11 = vld [vmem:[#allocation7] sm:$0xff]   ;;  %v1156_v16 = vld [vmem:[#allocation7 + $0x8] sm:$0xff]   ;;  %v1160_v20 = vld [vmem:[#allocation7 + $0x10] sm:$0xff]   ;;  %p1249_p10 = scmp.ne.s32.totalorder %s895_s23, %s1248_s24  ;;  %p1254_p12 = scmp.lt.s32.totalorder %s1248_s24, %s1248_s24 }
  0x51   :  { %478 = vmatpush1.bf16.msra.mxu0 %v1094_v26  ;;  %519 = vmatpush1.bf16.msra.mxu1 %v1095_v27  ;;  %v1153_v13 = vld [vmem:[#allocation7 + $0x80] sm:$0xff]   ;;  %v1157_v17 = vld [vmem:[#allocation7 + $0x88] sm:$0xff]   ;;  %v1161_v21 = vld [vmem:[#allocation7 + $0x90] sm:$0xff]  }
  0x52   :  { %479 = vmatprep.subr.bf16.mxu0 %v1096_v28  ;;  %520 = vmatprep.subr.bf16.mxu1 %v1098_v29  ;;  %v1162_v22 = vld [vmem:[#allocation7 + $0x58] sm:$0xff]   ;;  %v1166_v26 = vld [vmem:[#allocation7 + $0x60] sm:$0xff]   ;;  %p1255_p13 = por %p1254_p12, %p1253_p11 }
  0x53   :  { %v1163_v23 = vld [vmem:[#allocation7 + $0xd8] sm:$0xff]   ;;  %v1167_v27 = vld [vmem:[#allocation7 + $0xe0] sm:$0xff]  }
  0x54   :  { %v1164_v24 = vld [vmem:[#allocation7 + $0x18] sm:$0xff]   ;;  %v1168_v28 = vld [vmem:[#allocation7 + $0x20] sm:$0xff]   ;;  %p1256_p0 = pnand %p1255_p13, %p1249_p10 }
  0x55   :  { %480 = vmatpush1.bf16.msra.mxu0 %v1100_v30  ;;  %521 = vmatpush1.bf16.msra.mxu1 %v1101_v31  ;;  %v1165_v25 = vld [vmem:[#allocation7 + $0x98] sm:$0xff]   ;;  %v1169_v29 = vld [vmem:[#allocation7 + $0xa0] sm:$0xff]   ;;  %v1170_v30 = vld [vmem:[#allocation7 + $0x68] sm:$0xff]  }
  0x56   :  { %481 = vmatprep.subr.bf16.mxu0 %v1102_v32  ;;  %522 = vmatprep.subr.bf16.mxu1 %v1104_v33  ;;  %v1171_v31 = vld [vmem:[#allocation7 + $0xe8] sm:$0xff]   ;;  %v1178_v38 = vld [vmem:[#allocation7 + $0x78] sm:$0xff]  }
  0x57   :  { %v1172_v32 = vld [vmem:[#allocation7 + $0x28] sm:$0xff]   ;;  %v1179_v39 = vld [vmem:[#allocation7 + $0xf8] sm:$0xff]  }
  0x58   :  { %v1173_v33 = vld [vmem:[#allocation7 + $0xa8] sm:$0xff]   ;;  %v1180_v40 = vld [vmem:[#allocation7 + $0x38] sm:$0xff]  }
  0x59   :  { %482 = vmatpush1.bf16.msra.mxu0 %v1106_v34  ;;  %523 = vmatpush1.bf16.msra.mxu1 %v1107_v35  ;;  %v1174_v34 = vld [vmem:[#allocation7 + $0x70] sm:$0xff]  }
  0x5a   :  { %483 = vmatprep.subr.bf16.mxu0 %v1108_v36  ;;  %524 = vmatprep.subr.bf16.mxu1 %v1110_v37  ;;  %v1175_v35 = vld [vmem:[#allocation7 + $0xf0] sm:$0xff]  }
  0x5b   :  { %v1176_v36 = vld [vmem:[#allocation7 + $0x30] sm:$0xff]  }
  0x5c   :  { %v1177_v37 = vld [vmem:[#allocation7 + $0xb0] sm:$0xff]  }
  0x5d   :  { %484 = vmatpush1.bf16.msra.mxu0 %v1112_v41  ;;  %525 = vmatpush1.bf16.msra.mxu1 %v1113_v42  ;;  %v1181_v41 = vld [vmem:[#allocation7 + $0xb8] sm:$0xff]  }
  0x5e   :  { %485 = vmatprep.subr.bf16.mxu0 %v1114_v43  ;;  %526 = vmatprep.subr.bf16.mxu1 %v1116_v44 }
  0x61   :  { %486 = vmatpush1.bf16.msra.mxu0 %v1118_v47  ;;  %527 = vmatpush1.bf16.msra.mxu1 %v1119_v48 }
  0x62   :  { %487 = vmatprep.subr.bf16.mxu0 %v1120_v49  ;;  %528 = vmatprep.subr.bf16.mxu1 %v1122_v50 }
  0x65   :  { %488 = vmatpush1.bf16.msra.mxu0 %v1124_v51  ;;  %529 = vmatpush1.bf16.msra.mxu1 %v1125_v52 }
  0x66   :  { %489 = vmatprep.subr.bf16.mxu0 %v1126_v55  ;;  %530 = vmatprep.subr.bf16.mxu1 %v1128_v57 }
  0x69   :  { %490 = vmatpush1.bf16.msra.mxu0 %v1130_v58  ;;  %531 = vmatpush1.bf16.msra.mxu1 %v1131_v60 }
  0x6a   :  { %491 = vmatprep.subr.bf16.mxu0 %v1132_v61  ;;  %532 = vmatprep.subr.bf16.mxu1 %v1134_v62 }
  0x6d   :  { %492 = vmatpush1.bf16.msra.mxu0 %v1136_v63  ;;  %533 = vmatpush1.bf16.msra.mxu1 %v1137_v0 }
  0x6e   :  { %493 = vmatprep.subr.bf16.mxu0 %v1138_v1  ;;  %534 = vmatprep.subr.bf16.mxu1 %v1140_v2 }
  0x71   :  { %494 = vmatpush1.bf16.msra.mxu0 %v1142_v3  ;;  %535 = vmatpush1.bf16.msra.mxu1 %v1143_v4 }
  0x72   :  { %495 = vmatprep.subr.bf16.mxu0 %v1144_v5  ;;  %536 = vmatprep.subr.bf16.mxu1 %v1146_v6 }
  0x75   :  { %496 = vmatpush1.bf16.msra.mxu0 %v1148_v7  ;;  %537 = vmatpush1.bf16.msra.mxu1 %v1149_v8 }
  0x76   :  { %1001 = vmatprep.subr.bf16.mxu0 %v1150_v9  ;;  %1023 = vmatprep.subr.bf16.mxu1 %v1151_v10 }
  0x78   :  { %498 = vmatmul.mubr.bf16.vlgmr.msra.gmra.mrb[0].mxu0 %v135_v12  ;;  %539 = vmatmul.mubr.bf16.vlgmr.msra.gmra.mrb[0].mxu1 %v135_v12 }
  0x79   :  { %1002 = vmatpush3.bf16.msra.mxu0 %v1152_v11  ;;  %1024 = vmatpush3.bf16.msra.mxu1 %v1153_v13 }
  0x7a   :  { %1003 = vmatprep.subr.bf16.mxu0 %v1154_v14  ;;  %1025 = vmatprep.subr.bf16.mxu1 %v1155_v15 }
  0x7d   :  { %1004 = vmatpush3.bf16.msra.mxu0 %v1156_v16  ;;  %1026 = vmatpush3.bf16.msra.mxu1 %v1157_v17 }
  0x7e   :  { %1005 = vmatprep.subr.bf16.mxu0 %v1158_v18  ;;  %1027 = vmatprep.subr.bf16.mxu1 %v1159_v19 }
  0x81   :  { %1006 = vmatpush3.bf16.msra.mxu0 %v1160_v20  ;;  %1028 = vmatpush3.bf16.msra.mxu1 %v1161_v21 }
  0x82   :  { %1007 = vmatprep.subr.bf16.mxu0 %v1162_v22  ;;  %1029 = vmatprep.subr.bf16.mxu1 %v1163_v23 }
  0x85   :  { %1008 = vmatpush3.bf16.msra.mxu0 %v1164_v24  ;;  %1030 = vmatpush3.bf16.msra.mxu1 %v1165_v25 }
  0x86   :  { %1009 = vmatprep.subr.bf16.mxu0 %v1166_v26  ;;  %1031 = vmatprep.subr.bf16.mxu1 %v1167_v27 }
  0x89   :  { %1010 = vmatpush3.bf16.msra.mxu0 %v1168_v28  ;;  %1032 = vmatpush3.bf16.msra.mxu1 %v1169_v29 }
  0x8a   :  { %1011 = vmatprep.subr.bf16.mxu0 %v1170_v30  ;;  %1033 = vmatprep.subr.bf16.mxu1 %v1171_v31 }
  0x8d   :  { %1012 = vmatpush3.bf16.msra.mxu0 %v1172_v32  ;;  %1034 = vmatpush3.bf16.msra.mxu1 %v1173_v33 }
  0x8e   :  { %1013 = vmatprep.subr.bf16.mxu0 %v1174_v34  ;;  %1035 = vmatprep.subr.bf16.mxu1 %v1175_v35 }
  0x91   :  { %1014 = vmatpush3.bf16.msra.mxu0 %v1176_v36  ;;  %1036 = vmatpush3.bf16.msra.mxu1 %v1177_v37 }
  0x92   :  { %1015 = vmatprep.subr.bf16.mxu0 %v1178_v38  ;;  %1037 = vmatprep.subr.bf16.mxu1 %v1179_v39 }
  0x95   :  { %1016 = vmatpush3.bf16.msra.mxu0 %v1180_v40  ;;  %1038 = vmatpush3.bf16.msra.mxu1 %v1181_v41 }
 0x14b   :  { %v499_v42 = vpop.f32.mrb[0].mxu0  ;;  %v540_v43 = vpop.f32.mrb[0].mxu1 }
 0x14c   :  { %v501_v44 = vpop.f32.mrb[1].mxu0  ;;  %v542_v45 = vpop.f32.mrb[1].mxu1  ;;  %v547_v50 = vpack.c.bf16 %v499_v42, %v499_v42  ;;  %v549_v51 = vpack.c.bf16 %v540_v43, %v540_v43 }
 0x14d   :  { %v548_v46 = vpack.c.bf16 %v501_v44, %v501_v44  ;;  %v550_v47 = vpack.c.bf16 %v542_v45, %v542_v45  ;;  %v503_v48 = vpop.f32.mrb[2].mxu0  ;;  %v544_v49 = vpop.f32.mrb[2].mxu1 }
 0x14e   :  { %v504_v52 = vpop.f32.mrb[3].mxu0  ;;  %v545_v53 = vpop.f32.mrb[3].mxu1 }
 0x14f   :  { %839 = vmatprep.mubr.bf16.mxu0 %v548_v46  ;;  %879 = vmatprep.mubr.bf16.mxu1 %v550_v47 }
 0x150   :  { %840 = vmatmul.mubr.bf16.vlgmr.msra.gmra.mrb[4].mxu0 %v547_v50  ;;  %880 = vmatmul.mubr.bf16.vlgmr.msra.gmra.mrb[4].mxu1 %v549_v51 }
 0x223   :  { %v1017_v54 = vpop.f32.mrb[4].mxu0  ;;  %v1039_v55 = vpop.f32.mrb[4].mxu1 }
 0x224   :  { %v1018_v56 = vpop.f32.mrb[5].mxu0  ;;  %v1040_v57 = vpop.f32.mrb[5].mxu1 }
 0x225   :  { %v1019_v58 = vadd.f32 %v1018_v56, %v1017_v54  ;;  %v1041_v59 = vadd.f32 %v1040_v57, %v1039_v55  ;;  %v1020_v60 = vpop.f32.mrb[6].mxu0  ;;  %v1042_v61 = vpop.f32.mrb[6].mxu1 }
 0x226   :  { %v1021_v62 = vpop.f32.mrb[7].mxu0  ;;  %v1043_v63 = vpop.f32.mrb[7].mxu1 }
 0x227   :  { %v882_v0 = vadd.f32 %v1041_v59, %v1019_v58 }
 0x229   :  { %887 = vst [vmem:[#allocation8] sm:$0x3] %v882_v0 }
 0x22a   :  { %1259 = shalt.err (!%p1256_p0)
}
 0x22b   :  { %s1260_s27 = scalar_lea.hbm %s1356_s3, 32 }
 0x22c   :  { %p1261_p1 = scmp.ne.s32.totalorder %s1356_s3, %s1260_s27  ;;  %p1264_p2 = scmp.lt.u32.totalorder %s1260_s27, %s1356_s3 }
 0x22e   :  { %p1266_p3 = pnand %p1264_p2, %p1261_p1 }
 0x230   :  { %1269 = shalt.err (!%p1266_p3)
}
 0x231   :  { %897 = dma.vmem_to_hbm [thread:$0]  %s895_s23, 32, %s1356_s3, [#allocation4]  }
 0x232   :  { %1274 = dma.done.wait [#allocation4], 32  }
 0x233   :  { %1275 = vsyncadd [#allocation4], 4294967264 }
 0x234   :  { %901 = vsyncpa [#allocation3], 1 }
 0x235   :  { %902 = vsyncpa [#allocation6], 1 }
 0x236   :  { %903 = vsyncpa [#allocation4], 1 }

</bundles_post_ra>
